<compile_context>
chip_gen: v7x
topology: tpu7x:2x2x1
jax: 0.10.0
libtpu: 0.0.40
codegen_flags: <defaults>
</compile_context>

<pallas_src>
import functools

import numpy as np

import jax
import jax.numpy as jnp
from jax.experimental import pallas as pl
from jax.experimental.pallas import tpu as pltpu

EPS = 1e-8
LOCAL_LOSS_COEFF = 0.5

_TARGET_BLOCK_BYTES = 2 * 1024 * 1024  # ~2 MiB/input block; x4 with 2 inputs x 2 bufs


def _psnr_sums_kernel(bbox_ref, x_ref, y_ref, out_ref, *, img_h, mask_h_tail):
    """Per-(batch-block, H-tile) squared-error partial sums.

    bbox_ref : SMEM (B, 4) int32, scalar-prefetched (y0, x0, y1, x1), half-open,
               already clamped to the image.
    x_ref    : VMEM (b_blk, C, h_tile, W)
    y_ref    : VMEM (b_blk, C, h_tile, W)
    out_ref  : VMEM (b_blk, 1, 2, W) f32
               [i, 0, 0, :] = per-lane full-image SSE of sample i in this tile
               [i, 0, 1, :] = per-lane bbox SSE of sample i in this tile
    """
    b_blk, _, h_tile, w = x_ref.shape
    b0 = pl.program_id(0) * b_blk
    h0 = pl.program_id(1) * h_tile

    # Separable mask coordinates: rows (sublanes) carry h, lanes carry w.
    h_idx = h0 + jax.lax.broadcasted_iota(jnp.int32, (1, h_tile, 1), 1)
    w_idx = jax.lax.broadcasted_iota(jnp.int32, (1, 1, w), 2)

    rows = []
    for i in range(b_blk):  # static unroll (b_blk <= 8)
        y0 = bbox_ref[b0 + i, 0]
        x0 = bbox_ref[b0 + i, 1]
        y1 = bbox_ref[b0 + i, 2]
        x1 = bbox_ref[b0 + i, 3]

        d = x_ref[i].astype(jnp.float32) - y_ref[i].astype(jnp.float32)
        sq = d * d                                          # (C, h_tile, W)

        if mask_h_tail:
            # Last H-tile may overrun the image: drop garbage rows.
            sq = jnp.where(h_idx < img_h, sq, 0.0)

        in_box = ((h_idx >= y0) & (h_idx < y1) &
                  (w_idx >= x0) & (w_idx < x1))              # (1, h_tile, W)

        sse_full_lane = jnp.sum(sq, axis=(0, 1))                         # (W,)
        sse_box_lane = jnp.sum(jnp.where(in_box, sq, 0.0), axis=(0, 1))  # (W,)
        rows.append(jnp.stack([sse_full_lane, sse_box_lane]))            # (2, W)

    # One unmasked, lane-dense store of the whole output block.
    out_ref[...] = jnp.stack(rows)[:, None, :, :]            # (b_blk, 1, 2, W)


def psnr_hybrid_loss(xs, ys, bbox, local_loss_coeff=LOCAL_LOSS_COEFF,
                     target_block_bytes=_TARGET_BLOCK_BYTES):
    B, C, H, W = xs.shape
    assert ys.shape == xs.shape
    itemsize = jnp.dtype(xs.dtype).itemsize

    # Clamp bbox to the image (matches torch slicing xs[:, :, y0:y1, x0:x1]).
    bbox = bbox.astype(jnp.int32)
    y0c = jnp.clip(bbox[:, 0], 0, H)
    x0c = jnp.clip(bbox[:, 1], 0, W)
    y1c = jnp.clip(bbox[:, 2], 0, H)
    x1c = jnp.clip(bbox[:, 3], 0, W)
    bbox_c = jnp.stack([y0c, x0c, y1c, x1c], axis=1)

    # ---- Tiling over H (channel dim stays whole -> no mod for h) ----------
    row_mult = max(8, 32 // itemsize)          # min sublane tile: f32 8, bf16 16, i8 32
    sample_bytes = C * H * W * itemsize
    row_bytes = C * W * itemsize               # bytes per H-row (all channels)

    if sample_bytes <= target_block_bytes:
        h_tile, nh = H, 1
    else:
        h_tile = (max(1, target_block_bytes // row_bytes) // row_mult) * row_mult
        h_tile = max(h_tile, row_mult)
        if h_tile >= H:
            h_tile, nh = H, 1
        else:
            nh = pl.cdiv(H, h_tile)
    mask_h_tail = (nh * h_tile != H)

    # ---- Batch-block tiny samples (b_blk | B, cap 8, keep >= 2 grid steps) -
    b_blk = 1
    if nh == 1 and B > 1:
        blk_bytes = C * h_tile * W * itemsize
        for d in range(2, min(8, B) + 1):
            if d < B and B % d == 0 and d * blk_bytes <= target_block_bytes:
                b_blk = d
    nb = B // b_blk

    # ---- Derived VMEM limit: 2 inputs x 2 buffers + f32 compute slack ------
    in_block_bytes = b_blk * C * h_tile * W * itemsize
    f32_block_bytes = b_blk * C * h_tile * W * 4
    vmem_limit = 2 * 2 * in_block_bytes + 4 * f32_block_bytes + (2 << 20)
    vmem_limit = int(min(max(vmem_limit, 16 << 20), 64 << 20))

    kernel = functools.partial(_psnr_sums_kernel, img_h=H, mask_h_tail=mask_h_tail)

    partials = pl.pallas_call(
        kernel,
        out_shape=jax.ShapeDtypeStruct((B, nh, 2, W), jnp.float32),
        grid_spec=pltpu.PrefetchScalarGridSpec(
            num_scalar_prefetch=1,
            grid=(nb, nh),
            in_specs=[
                pl.BlockSpec((b_blk, C, h_tile, W), lambda b, t, bb: (b, 0, t, 0)),
                pl.BlockSpec((b_blk, C, h_tile, W), lambda b, t, bb: (b, 0, t, 0)),
            ],
            out_specs=pl.BlockSpec((b_blk, 1, 2, W), lambda b, t, bb: (b, t, 0, 0)),
        ),
        compiler_params=pltpu.CompilerParams(
            dimension_semantics=("parallel", "parallel"),
            vmem_limit_bytes=vmem_limit),
    )(bbox_c, xs, ys)

    # Tiny epilogue in plain JAX: cross-tile/lane sum, log, mean, blend.
    sse_full = jnp.sum(partials[:, :, 0, :], axis=(1, 2))    # (B,)
    sse_box = jnp.sum(partials[:, :, 1, :], axis=(1, 2))     # (B,)

    n = C * H * W
    scale = 10.0 / float(np.log(10.0))

    mse_full = sse_full / jnp.float32(n)
    psnr_loss = scale * jnp.mean(jnp.log(mse_full + EPS))

    # Note: empty / degenerate bbox (area == 0) is clamped to 1 element ->
    # mse_local = 0, where the PyTorch crop-then-mean would be NaN/undefined.
    area = (jnp.maximum(y1c - y0c, 0) * jnp.maximum(x1c - x0c, 0)).astype(jnp.float32)
    n_local = jnp.maximum(area * jnp.float32(C), 1.0)
    mse_local = sse_box / n_local
    psnr_local_loss = scale * jnp.mean(jnp.log(mse_local + EPS))

    return (1.0 - local_loss_coeff) * psnr_loss + local_loss_coeff * psnr_local_loss


def _reference(xs, ys, bbox, c=LOCAL_LOSS_COEFF):
    xs = np.asarray(xs, np.float64)
    ys = np.asarray(ys, np.float64)
    bbox = np.asarray(bbox)
    scale = 10.0 / np.log(10.0)
    mse_full = ((xs - ys) ** 2).mean(axis=(1, 2, 3))
    g = scale * np.mean(np.log(mse_full + EPS))
    locs = []
    for b in range(xs.shape[0]):
        y0, x0, y1, x1 = bbox[b]
        crop = (xs[b, :, y0:y1, x0:x1] - ys[b, :, y0:y1, x0:x1]) ** 2
        locs.append(np.log(crop.mean() + EPS))
    l = scale * np.mean(locs)
    return (1.0 - c) * g + c * l


if __name__ == "__main__":
    key = jax.random.PRNGKey(0)
    k1, k2, k3, k4, k5, k6 = jax.random.split(key, 6)

    # 1) Base config (b_blk=1, single H tile).
    B, C, H, W = 2, 4, 16, 16
    xs = jax.random.uniform(k1, (B, C, H, W), dtype=jnp.float32)
    ys = jax.random.uniform(k2, (B, C, H, W), dtype=jnp.float32)
    bbox = jnp.array([[2, 3, 10, 12],
                      [4, 1, 14, 9]], dtype=jnp.int32)
    loss = psnr_hybrid_loss(xs, ys, bbox)
    jax.block_until_ready(loss)
    ref = _reference(xs, ys, bbox)
    assert abs(float(loss) - float(ref)) < 1e-4, (float(loss), float(ref))

    # 2) Batch-blocked path (B=4 -> b_blk=2, per-sample bbox loop in kernel).
    B2 = 4
    xs2 = jax.random.uniform(k3, (B2, C, H, W), dtype=jnp.float32)
    ys2 = jax.random.uniform(k4, (B2, C, H, W), dtype=jnp.float32)
    bbox2 = jnp.array([[0, 0, 16, 16],
                       [5, 5, 6, 6],
                       [2, 3, 10, 12],
                       [1, 0, 15, 13]], dtype=jnp.int32)
    loss2 = psnr_hybrid_loss(xs2, ys2, bbox2)
    jax.block_until_ready(loss2)
    ref2 = _reference(xs2, ys2, bbox2)
    assert abs(float(loss2) - float(ref2)) < 1e-4, (float(loss2), float(ref2))

    # 3) Forced H tiling with a ragged last tile (exercises the tail mask),
    #    via a tiny block-byte budget on a small input.
    B3, H3 = 2, 20
    xs3 = jax.random.uniform(k5, (B3, C, H3, W), dtype=jnp.float32)
    ys3 = jax.random.uniform(k6, (B3, C, H3, W), dtype=jnp.float32)
    bbox3 = jnp.array([[3, 2, 17, 14],
                       [0, 5, 20, 16]], dtype=jnp.int32)
    loss3 = psnr_hybrid_loss(xs3, ys3, bbox3, target_block_bytes=1024)
    jax.block_until_ready(loss3)
    ref3 = _reference(xs3, ys3, bbox3)
    assert abs(float(loss3) - float(ref3)) < 1e-4, (float(loss3), float(ref3))

    print("KERNEL_OK")
</pallas_src>

<mosaic_0001>
module attributes {stable_mosaic.version = 11 : i64} {
  func.func @_psnr_sums_kernel(%arg0: i32, %arg1: i32, %arg2: memref<2x4xi32, #tpu.memory_space<smem>>, %arg3: memref<1x4x16x16xf32, #tpu.memory_space<vmem>>, %arg4: memref<1x4x16x16xf32, #tpu.memory_space<vmem>>, %arg5: memref<1x1x2x16xf32, #tpu.memory_space<vmem>>) attributes {dimension_semantics = [#tpu.dimension_semantics<parallel>, #tpu.dimension_semantics<parallel>], iteration_bounds = array<i64: 2, 1>, scalar_prefetch = 1 : i64, scratch_operands = 0 : i64, tpu.core_type = #tpu.core_type<tc>, window_params = [{transform_indices = @transform_0, window_bounds = array<i64: 1, 4, 16, 16>}, {transform_indices = @transform_1, window_bounds = array<i64: 1, 4, 16, 16>}, {transform_indices = @transform_2, window_bounds = array<i64: 1, 1, 2, 16>}]} {
    %c1_i32 = arith.constant 1 : i32
    %0 = arith.muli %arg0, %c1_i32 : i32
    %c16_i32 = arith.constant 16 : i32
    %1 = arith.muli %arg1, %c16_i32 : i32
    %2 = tpu.iota {dimensions = array<i32: 1>} : vector<1x16x1xi32>
    %3 = vector.broadcast %1 : i32 to vector<1x16x1xi32>
    %4 = arith.addi %3, %2 : vector<1x16x1xi32>
    %5 = tpu.iota {dimensions = array<i32: 2>} : vector<1x1x16xi32>
    %c0_i32 = arith.constant 0 : i32
    %6 = arith.addi %0, %c0_i32 : i32
    %7 = arith.index_cast %6 : i32 to index
    %c0 = arith.constant 0 : index
    %8 = memref.load %arg2[%7, %c0] : memref<2x4xi32, #tpu.memory_space<smem>>
    %c0_i32_0 = arith.constant 0 : i32
    %9 = arith.addi %0, %c0_i32_0 : i32
    %10 = arith.index_cast %9 : i32 to index
    %c1 = arith.constant 1 : index
    %11 = memref.load %arg2[%10, %c1] : memref<2x4xi32, #tpu.memory_space<smem>>
    %c0_i32_1 = arith.constant 0 : i32
    %12 = arith.addi %0, %c0_i32_1 : i32
    %13 = arith.index_cast %12 : i32 to index
    %c2 = arith.constant 2 : index
    %14 = memref.load %arg2[%13, %c2] : memref<2x4xi32, #tpu.memory_space<smem>>
    %c0_i32_2 = arith.constant 0 : i32
    %15 = arith.addi %0, %c0_i32_2 : i32
    %16 = arith.index_cast %15 : i32 to index
    %c3 = arith.constant 3 : index
    %17 = memref.load %arg2[%16, %c3] : memref<2x4xi32, #tpu.memory_space<smem>>
    %c0_3 = arith.constant 0 : index
    %c0_4 = arith.constant 0 : index
    %c0_5 = arith.constant 0 : index
    %c0_6 = arith.constant 0 : index
    %18 = vector.load %arg3[%c0_3, %c0_4, %c0_5, %c0_6] : memref<1x4x16x16xf32, #tpu.memory_space<vmem>>, vector<1x4x16x16xf32>
    %19 = vector.shape_cast %18 : vector<1x4x16x16xf32> to vector<4x16x16xf32>
    %c0_7 = arith.constant 0 : index
    %c0_8 = arith.constant 0 : index
    %c0_9 = arith.constant 0 : index
    %c0_10 = arith.constant 0 : index
    %20 = vector.load %arg4[%c0_7, %c0_8, %c0_9, %c0_10] : memref<1x4x16x16xf32, #tpu.memory_space<vmem>>, vector<1x4x16x16xf32>
    %21 = vector.shape_cast %20 : vector<1x4x16x16xf32> to vector<4x16x16xf32>
    %22 = arith.subf %19, %21 : vector<4x16x16xf32>
    %23 = arith.mulf %22, %22 : vector<4x16x16xf32>
    %24 = vector.broadcast %8 : i32 to vector<1x16x1xi32>
    %25 = arith.cmpi sge, %4, %24 : vector<1x16x1xi32>
    %26 = vector.broadcast %14 : i32 to vector<1x16x1xi32>
    %27 = arith.cmpi slt, %4, %26 : vector<1x16x1xi32>
    %28 = arith.andi %25, %27 : vector<1x16x1xi1>
    %29 = vector.broadcast %11 : i32 to vector<1x1x16xi32>
    %30 = arith.cmpi sge, %5, %29 : vector<1x1x16xi32>
    %31 = vector.broadcast %28 : vector<1x16x1xi1> to vector<1x16x16xi1>
    %32 = vector.broadcast %30 : vector<1x1x16xi1> to vector<1x16x16xi1>
    %33 = arith.andi %31, %32 : vector<1x16x16xi1>
    %34 = vector.broadcast %17 : i32 to vector<1x1x16xi32>
    %35 = arith.cmpi slt, %5, %34 : vector<1x1x16xi32>
    %36 = vector.broadcast %35 : vector<1x1x16xi1> to vector<1x16x16xi1>
    %37 = arith.andi %33, %36 : vector<1x16x16xi1>
    %cst = arith.constant dense<0.000000e+00> : vector<16xf32>
    %38 = vector.multi_reduction <add>, %23, %cst [0, 1] : vector<4x16x16xf32> to vector<16xf32>
    %cst_11 = arith.constant 0.000000e+00 : f32
    %39 = vector.shape_cast %37 : vector<1x16x16xi1> to vector<1x16x16xi1>
    %40 = vector.broadcast %39 : vector<1x16x16xi1> to vector<4x16x16xi1>
    %41 = vector.broadcast %cst_11 : f32 to vector<4x16x16xf32>
    %42 = arith.select %40, %23, %41 : vector<4x16x16xi1>, vector<4x16x16xf32>
    %cst_12 = arith.constant dense<0.000000e+00> : vector<16xf32>
    %43 = vector.multi_reduction <add>, %42, %cst_12 [0, 1] : vector<4x16x16xf32> to vector<16xf32>
    %44 = vector.shape_cast %38 : vector<16xf32> to vector<1x16xf32>
    %45 = vector.shape_cast %43 : vector<16xf32> to vector<1x16xf32>
    %46 = tpu.concatenate %44, %45 in 0 : vector<1x16xf32>, vector<1x16xf32> -> vector<2x16xf32>
    %47 = vector.shape_cast %46 : vector<2x16xf32> to vector<1x2x16xf32>
    %48 = vector.shape_cast %47 : vector<1x2x16xf32> to vector<1x1x2x16xf32>
    %c0_13 = arith.constant 0 : index
    %c0_14 = arith.constant 0 : index
    %c0_15 = arith.constant 0 : index
    %c0_16 = arith.constant 0 : index
    %49 = vector.load %arg5[%c0_13, %c0_14, %c0_15, %c0_16] : memref<1x1x2x16xf32, #tpu.memory_space<vmem>>, vector<1x1x2x16xf32>
    tpu.vector_store %arg5[%c0_13, %c0_14, %c0_15, %c0_16], %48 {strides = array<i32>} : memref<1x1x2x16xf32, #tpu.memory_space<vmem>>, vector<1x1x2x16xf32>,
    return
  }
  func.func @transform_0(%arg0: i32, %arg1: i32, %arg2: memref<2x4xi32, #tpu.memory_space<smem>>) -> (i32, i32, i32, i32) {
    %c0_i32 = arith.constant 0 : i32
    %c0_i32_0 = arith.constant 0 : i32
    %c0_i32_1 = arith.constant 0 : i32
    return %arg0, %c0_i32, %arg1, %c0_i32_0 : i32, i32, i32, i32
  }
  func.func @transform_1(%arg0: i32, %arg1: i32, %arg2: memref<2x4xi32, #tpu.memory_space<smem>>) -> (i32, i32, i32, i32) {
    %c0_i32 = arith.constant 0 : i32
    %c0_i32_0 = arith.constant 0 : i32
    %c0_i32_1 = arith.constant 0 : i32
    return %arg0, %c0_i32, %arg1, %c0_i32_0 : i32, i32, i32, i32
  }
  func.func @transform_2(%arg0: i32, %arg1: i32, %arg2: memref<2x4xi32, #tpu.memory_space<smem>>) -> (i32, i32, i32, i32) {
    %c0_i32 = arith.constant 0 : i32
    %c0_i32_0 = arith.constant 0 : i32
    %c0_i32_1 = arith.constant 0 : i32
    return %arg0, %arg1, %c0_i32, %c0_i32_0 : i32, i32, i32, i32
  }
}

</mosaic_0001>

<bundles_post_ra>
// kernel: tpu_custom_call.1
= control target key start
LH: loop header
LB: loop body
LE: loop exit
PB: predicated region body
PF: predicated region fallthrough
CT: control target
= control target key end

     0   :  { %s1109_s0 = inlined_call_operand.hbm [shape: s32[2,4], index: 0, kind: input, shape index: {}]   ;;  %s1110_s1 = inlined_call_operand.hbm [shape: f32[2,4,16,16], index: 1, kind: input, shape index: {}]   ;;  %s1111_s2 = inlined_call_operand.hbm [shape: f32[2,4,16,16], index: 2, kind: input, shape index: {}]   ;;  %s1112_s3 = inlined_call_operand.hbm [shape: f32[2,1,2,16], index: 3, kind: output, shape index: {}]  }
   0x1   :  { %s577_s14 = scalar_lea.hbm %s1109_s0, 32 }
   0x2   :  { %p578_p0 = scmp.ne.s32.totalorder %s1109_s0, %s577_s14  ;;  %p581_p1 = scmp.lt.u32.totalorder %s577_s14, %s1109_s0 }
   0x4   :  { %p583_p2 = pnand %p581_p1, %p578_p0 }
   0x6   :  { %586 = shalt.err (!%p583_p2)  }
   0x7   :  { %s737_s19 = smov [#allocation3]  }
   0x8   :  { %9 = dma.hbm_to_smem %s1109_s0, 32, %s737_s19, [#allocation2] }
   0x9   :  { %699 = dma.done.wait [#allocation2], 32 }
   0xa   :  { %700 = vsyncadd [#allocation2], 4294967264 }
   0xb   :  { %11 = sfence }
   0xc   :  { %12 = vsyncpa [#allocation5], 0 }
   0xd   :  { %14 = vsyncpa [#allocation5 + $0x1], 0 }
   0xe   :  { %15 = vsyncpa [#allocation8], 0 }
   0xf   :  { %17 = vsyncpa [#allocation8 + $0x1], 0 }
  0x10   :  { %18 = vsyncpa [#allocation6], 0 }
  0x11   :  { %20 = vsyncpa [#allocation6 + $0x1], 0  ;;  %s775_s22 = smov 0   ;;  %s777_s23 = smov 0  }
  0x12   :  { %s779_s24 = smov 0   ;;  %s781_s25 = smov 0  }
  0x13   :  { %s783_s26 = smov 0   ;;  %s785_s0 = smov 0  }
  0x14 LB: > { %s486_s27 = sadd.s32 4294967295, %s735_s0   ;;  %s487_s28 = sadd.s32 4294967294, %s735_s0   ;;  %s735_s0 = sphi %s785_s0, %s26_s0   ;;  %s731_s26 = sphi %s783_s26, %s1144_s26   ;;  %s727_s25 = sphi %s781_s25, %s1143_s25   ;;  %s723_s24 = sphi %s779_s24, %s1142_s24   ;;  %s719_s23 = sphi %s777_s23, %s1141_s23   ;;  %s715_s22 = sphi %s775_s22, %s1140_s22  }
  0x15   : > { %s38_s29 = sadd.s32 1, %s731_s26  ;;  %s47_s30 = sadd.s32 1, %s723_s24 }
  0x16   : > { %p40_p3 = scmp.ge.s32.totalorder %s38_s29, 2  ;;  %p54_p4 = scmp.ne.s32.totalorder %s723_s24, %s719_s23 }
  0x17   : > { %p55_p5 = scmp.eq.s32.totalorder %s735_s0, 0  ;;  %p60_p6 = scmp.ne.s32.totalorder %s719_s23, %s715_s22 }
  0x18   : > { %s1146_s29 = smov (%p40_p3, %s38_s29), 0  ;;  %p61_p8 = scmp.eq.s32.totalorder %s486_s27, 0 }
  0x19   : > { %p816_p7 = por %p55_p5, %p54_p4  ;;  %s42_s5 = ssub.s32 %s731_s26, %s1146_s29 }
  0x1a   : > { %p114_p9 = scmp.eq.s32.totalorder %s486_s27, 1  ;;  %p45_p10 = scmp.eq.s32.totalorder %s42_s5, 0 }
  0x1b   : > { %p822_p11 = por %p61_p8, %p60_p6  ;;  %p120_p13 = scmp.eq.s32.totalorder %s487_s28, 1 }
  0x1c   : > { %p826_p12 = por %p114_p9, %p54_p4  ;;  %p524_p2 = scmp.lt.s32.totalorder %s735_s0, 2 }
  0x1d   : > { %s1116_s6 = scalar_select %p822_p11, 1, 0 }
  0x1e   : > { %s1117_s7 = scalar_select %p826_p12, 1, 0 }
  0x1f   : > { %s831_s8 = scalar_select %p45_p10, %s723_s24, %s47_s30  }
  0x20   : > { %p833_p0 = por %p120_p13, %p60_p6  ;;  %s840_s10 = sand.u32 1, %s723_s24  }
  0x21   : > { %s490_s11 = sshll.u32 %s840_s10, 6  ;;  %s505_s12 = sshll.u32 %s731_s26, 10 }
  0x22   : > { %s1118_s9 = scalar_select %p833_p0, 1, 0 }
  0x23   : > { %s849_s15 = scalar_lea.hbm %s1110_s1, %s505_s12  ;;  %s144_s16 = scalar_lea.vmem [#allocation4], %s490_s11 }
  0x24   : > { %s153_s17 = sshll.u32 %s144_s16, 4  ;;  %p857_p3 = pnand %p524_p2, %p816_p7  ;;  %s853_s17 = int_to_ptr.vmem [resolvable:$true] %s153_s17 }
  0x25   : > { %s141_s19 = scalar_lea.sflag [#allocation5], %s840_s10  ;;  %s587_s20 = scalar_lea.hbm %s849_s15, 1024 }
  0x26   : > { %p588_p5 = scmp.ne.s32.totalorder %s849_s15, %s587_s20  ;;  %p589_p6 = pneg %p857_p3 }
  0x27   : > { %s592_s28 = scalar_lea.hbm %s1110_s1, 2048  ;;  %p593_p7 = scmp.lt.u32.totalorder %s849_s15, %s1110_s1 }
  0x28   : > { %p590_p8 = pnand %p589_p6, %p588_p5  ;;  %p594_p10 = scmp.lt.u32.totalorder %s592_s28, %s587_s20 }
  0x29   : > { %p596_p2 = scmp.lt.u32.totalorder %s587_s20, %s849_s15 }
  0x2a   : > { %p591_p9 = pneg %p590_p8  ;;  %p595_p13 = por %p594_p10, %p593_p7 }
  0x2c   : > { %p597_p1 = por %p596_p2, %p595_p13 }
  0x2e   : > { %p598_p4 = pnand %p597_p1, %p591_p9 }
  0x30   : > { %601 = shalt.err (!%p598_p4)
}
  0x31   : > { %s602_s5 = scalar_lea.vmem %s853_s17, 1024  ;;  %s738_s13 = smov [#allocation4]  }
  0x32   : > { %p603_p5 = scmp.ne.s32.totalorder %s853_s17, %s602_s5  ;;  %s607_s14 = sshll.u32 %s738_s13, 4  ;;  %s608_s14 = int_to_ptr.vmem [resolvable:$false] %s607_s14 }
  0x33   : > { %s609_s16 = scalar_lea.vmem %s608_s14, 2048  ;;  %p610_p12 = scmp.lt.s32.totalorder %s853_s17, %s608_s14 }
  0x34   : > { %p605_p8 = pnand %p603_p5, %p589_p6  ;;  %p611_p7 = scmp.lt.s32.totalorder %s609_s16, %s602_s5 }
  0x36   : > { %p606_p0 = pneg %p605_p8  ;;  %p612_p10 = por %p611_p7, %p610_p12 }
  0x38   : > { %p613_p13 = pnand %p612_p10, %p606_p0 }
  0x3a   : > { %616 = shalt.err (!%p613_p13)
}
  0x3b   : > { %s739_s20 = smov 128   ;;  %s740_s21 = smov 8  }
  0x3c   : > { %516 = dma.hbm_to_vmem [thread:$0]  (!%p857_p3), %s849_s15, 1024, %s853_s17, %s141_s19, %s739_s20, %s739_s20, %s740_s21  }
  0x3d   : > { %p184_p12 = scmp.lt.s32.totalorder %s735_s0, 3  ;;  %s899_s30 = scalar_lea.hbm %s1111_s2, %s505_s12 }
  0x3e   : > { %p1120_p0 = scmp.ge.s32.totalorder %s735_s0, 1  ;;  %s167_s5 = scalar_lea.vmem [#allocation7], %s490_s11 }
  0x3f   : > { %s176_s13 = sshll.u32 %s167_s5, 4  ;;  %s164_s15 = scalar_lea.sflag [#allocation8], %s840_s10  ;;  %s909_s13 = int_to_ptr.vmem [resolvable:$true] %s176_s13 }
  0x40   : > { %p903_p1 = pnand %p1120_p0, %p184_p12  ;;  %s617_s17 = scalar_lea.hbm %s899_s30, 1024 }
  0x41   : > { %p618_p4 = scmp.ne.s32.totalorder %s899_s30, %s617_s17  ;;  %s622_s14 = scalar_lea.hbm %s1111_s2, 2048 }
  0x42   : > { %p623_p5 = scmp.lt.u32.totalorder %s899_s30, %s1111_s2  ;;  %p624_p8 = scmp.lt.u32.totalorder %s622_s14, %s617_s17 }
  0x43   : > { %p620_p9 = pnand %p618_p4, %p589_p6  ;;  %p626_p10 = scmp.lt.u32.totalorder %s617_s17, %s899_s30 }
  0x44   : > { %p625_p7 = por %p624_p8, %p623_p5 }
  0x45   : > { %p621_p2 = pneg %p620_p9 }
  0x46   : > { %p627_p13 = por %p626_p10, %p625_p7 }
  0x48   : > { %p628_p12 = pnand %p627_p13, %p621_p2 }
  0x4a   : > { %631 = shalt.err (!%p628_p12)
}
  0x4b   : > { %s632_s11 = scalar_lea.vmem %s909_s13, 1024  ;;  %s741_s28 = smov [#allocation7]  }
  0x4c   : > { %p633_p0 = scmp.ne.s32.totalorder %s909_s13, %s632_s11  ;;  %s637_s5 = sshll.u32 %s741_s28, 4  ;;  %s638_s5 = int_to_ptr.vmem [resolvable:$false] %s637_s5 }
  0x4d   : > { %s639_s12 = scalar_lea.vmem %s638_s5, 2048  ;;  %p640_p11 = scmp.lt.s32.totalorder %s909_s13, %s638_s5 }
  0x4e   : > { %p635_p4 = pnand %p633_p0, %p589_p6  ;;  %p641_p5 = scmp.lt.s32.totalorder %s639_s12, %s632_s11 }
  0x50   : > { %p636_p9 = pneg %p635_p4  ;;  %p642_p8 = por %p641_p5, %p640_p11 }
  0x52   : > { %p643_p7 = pnand %p642_p8, %p636_p9 }
  0x54   : > { %646 = shalt.err (!%p643_p7)
}
  0x55   : > { %519 = dma.hbm_to_vmem [thread:$0]  (!%p857_p3), %s899_s30, 1024, %s909_s13, %s164_s15, %s739_s20, %s739_s20, %s740_s21  }
  0x56   : > { %188 = sbr.rel (%p903_p1) target bundleno = 156 (0x9c), region = 28  ;;  %s943_s17 = sand.u32 (!%p903_p1), 1, %s719_s23  }
  0x57   : > { %s497_s19 = sshll.u32 (!%p903_p1), %s943_s17, 6  ;;  %s191_s14 = scalar_lea.sflag (!%p903_p1), [#allocation5], %s943_s17 }
  0x58   : > { %s947_s18 = scalar_lea.vmem (!%p903_p1), [#allocation4], %s497_s19  ;;  %p1122_p11 = scmp.ne.s32.totalorder (!%p903_p1), %s1116_s6, 0 }
  0x5d   : > { %702 = dma.done.wait (%p1122_p11), %s191_s14, 1024  }
  0x5e   : > { %704 = vsyncadd (%p1122_p11), %s191_s14, 4294966272  ;;  %s200_s10 = scalar_lea.sflag [#allocation8], %s943_s17  ;;  %s954_s20 = scalar_lea.vmem [#allocation7], %s497_s19 }
  0x5f   : > { %706 = dma.done.wait (%p1122_p11), %s200_s10, 1024  }
  0x60   : > { %708 = vsyncadd (%p1122_p11), %s200_s10, 4294966272  ;;  %v232_v0 = vlaneseq  ;;  %s500_s21 = sshll.u32 %s727_s25, 7  ;;  %v248_v4 = vld [vmem:[%s947_s18] sm:$0xff]  ;;  %v249_v5 = vld [vmem:[%s947_s18 + $0x8] sm:$0xff]  ;;  %vm304_vm6 = vcmask 130048   ;;  %s499_s11 = sshll.u32 %s943_s17, 1 }
  0x61   : > { %s241_s30 = sld [smem:[#allocation3 + %s500_s21]]  ;;  %s242_s4 = sadd.s32 1, %s500_s21  ;;  %v250_v7 = vld [vmem:[%s947_s18 + $0x10] sm:$0xff]  ;;  %v251_v8 = vld [vmem:[%s947_s18 + $0x18] sm:$0xff]  ;;  %v252_v9 = vld [vmem:[%s947_s18 + $0x20] sm:$0xff]  ;;  %vm359_vm13 = vcmask 1040384  }
  0x62   : > { %v233_v1 = vshrl.u32 %v232_v0, 7  ;;  %s244_s13 = sadd.s32 2, %s500_s21  ;;  %s961_s15 = sld [smem:[#allocation3 + %s242_s4]]  ;;  %v239_v3 = vand.u32 127, %v232_v0  ;;  %v253_v10 = vld [vmem:[%s947_s18 + $0x28] sm:$0xff]  ;;  %v254_v11 = vld [vmem:[%s947_s18 + $0x30] sm:$0xff] }
  0x63   : > { %s245_s16 = sld [smem:[#allocation3 + %s244_s13]]  ;;  %s246_s6 = sadd.s32 3, %s500_s21  ;;  %v256_v12 = vld [vmem:[%s954_s20] sm:$0xff]  ;;  %v257_v16 = vld [vmem:[%s954_s20 + $0x8] sm:$0xff]  ;;  %v258_v17 = vld [vmem:[%s954_s20 + $0x10] sm:$0xff]  ;;  %vm361_vm14 = vcmask 123904  }
  0x64   : > { %v234_v2 = vadd.s32 8, %v233_v1  ;;  %s963_s27 = sld [smem:[#allocation3 + %s246_s6]]  ;;  %v259_v18 = vld [vmem:[%s954_s20 + $0x18] sm:$0xff]  ;;  %v264_v19 = vsub.f32 %v248_v4, %v256_v12  ;;  %v260_v23 = vld [vmem:[%s954_s20 + $0x20] sm:$0xff]  ;;  %v261_v24 = vld [vmem:[%s954_s20 + $0x28] sm:$0xff]  ;;  %v265_v26 = vsub.f32 %v249_v5, %v257_v16  ;;  %v266_v27 = vsub.f32 %v250_v7, %v258_v17  ;;  %s228_s28 = scalar_lea.vmem [#allocation9], %s499_s11 }
  0x65   : > { %v262_v25 = vld [vmem:[%s954_s20 + $0x30] sm:$0xff]  ;;  %v267_v28 = vsub.f32 %v251_v8, %v259_v18  ;;  %v268_v30 = vsub.f32 %v252_v9, %v260_v23  ;;  %v269_v32 = vsub.f32 %v253_v10, %v261_v24  ;;  %v255_v36 = vld [vmem:[%s947_s18 + $0x38] sm:$0xff]  ;;  %s378_s5 = sshll.u32 %s228_s28, 4  ;;  %s502_s12 = sshll.u32 %s727_s25, 5  ;;  %s1057_s5 = int_to_ptr.vmem [resolvable:$true] %s378_s5 }
  0x66   : > { %v272_v31 = vmul.f32 %v264_v19, %v264_v19  ;;  %v273_v33 = vmul.f32 %v265_v26, %v265_v26  ;;  %v274_v34 = vmul.f32 %v266_v27, %v266_v27  ;;  %v263_v37 = vld [vmem:[%s954_s20 + $0x38] sm:$0xff]  ;;  %v270_v38 = vsub.f32 %v254_v11, %v262_v25  ;;  %s1062_s18 = scalar_lea.hbm %s1112_s3, %s502_s12  ;;  %s364_s10 = scalar_lea.sflag [#allocation6], %s943_s17 }
  0x67   : > { %v280_v6 = vstv %s241_s30  ;;  %v275_v35 = vmul.f32 %v267_v28, %v267_v28  ;;  %v276_v40 = vmul.f32 %v268_v30, %v268_v30  ;;  %v271_v46 = vsub.f32 %v255_v36, %v263_v37  ;;  %s647_s20 = scalar_lea.vmem %s1057_s5, 32  ;;  %p1137_p6 = scmp.ne.s32.totalorder %s1117_s7, 0 }
  0x68   : > { %vm973_vm0 = vcmp.ge.s32.totalorder %v233_v1, %v280_v6  ;;  %vm977_vm1 = vcmp.ge.s32.totalorder %v234_v2, %v280_v6  ;;  %v288_v22 = vstv %s961_s15  ;;  %v305_v41 = vsel %vm304_vm6, %v272_v31, 0.0  ;;  %p648_p3 = scmp.ne.s32.totalorder %s1057_s5, %s647_s20  ;;  %s742_s25 = smov [#allocation9]  }
  0x69   : > { %v283_v15 = vstv %s245_s16  ;;  %vm996_vm4 = vcmp.ge.s32.totalorder %v239_v3, %v288_v22  ;;  %v306_v42 = vsel %vm304_vm6, %v273_v33, 0.0  ;;  %v308_v45 = vsel %vm304_vm6, %v274_v34, 0.0  ;;  %s651_s21 = sshll.u32 %s742_s25, 4  ;;  %s652_s21 = int_to_ptr.vmem [resolvable:$false] %s651_s21 }
  0x6a   : > { %vm984_vm2 = vcmp.lt.s32.totalorder %v233_v1, %v283_v15  ;;  %vm988_vm3 = vcmp.lt.s32.totalorder %v234_v2, %v283_v15  ;;  %v298_v39 = vstv %s963_s27  ;;  %v307_v44 = vadd.f32 %v306_v42, %v305_v41  ;;  %p649_p1 = pnand %p648_p3, %p1137_p6  ;;  %s653_s30 = scalar_lea.vmem %s652_s21, 64 }
  0x6b   : > { %vm286_vm5 = vmand %vm973_vm0, %vm984_vm2  ;;  %vm299_vm10 = vcmp.lt.s32.totalorder %v239_v3, %v298_v39  ;;  %v277_v47 = vmul.f32 %v269_v32, %v269_v32  ;;  %v310_v49 = vsel %vm304_vm6, %v275_v35, 0.0  ;;  %v278_v54 = vmul.f32 %v270_v38, %v270_v38  ;;  %p654_p10 = scmp.lt.s32.totalorder %s1057_s5, %s652_s21  ;;  %p655_p13 = scmp.lt.s32.totalorder %s653_s30, %s647_s20 }
  0x6c   : > { %vm287_vm7 = vmand %vm977_vm1, %vm988_vm3  ;;  %v309_v51 = vadd.f32 %v308_v45, %v307_v44  ;;  %v312_v55 = vsel %vm304_vm6, %v276_v40, 0.0  ;;  %v279_v61 = vmul.f32 %v271_v46, %v271_v46  ;;  %p650_p2 = pneg %p649_p1 }
  0x6d   : > { %vm296_vm8 = vmand %vm286_vm5, %vm996_vm4  ;;  %v314_v62 = vsel %vm304_vm6, %v277_v47, 0.0  ;;  %v316_v3 = vsel %vm304_vm6, %v278_v54, 0.0  ;;  %p656_p12 = por %p655_p13, %p654_p10 }
  0x6e   : > { %vm297_vm9 = vmand %vm287_vm7, %vm996_vm4  ;;  %v311_v57 = vadd.f32 %v310_v49, %v309_v51  ;;  %v318_v8 = vsel %vm304_vm6, %v279_v61, 0.0 }
  0x6f   : > { %vm1017_vm11 = vmand %vm296_vm8, %vm299_vm10  ;;  %p657_p0 = pnand %p656_p12, %p650_p2 }
  0x70   : > { %vm1022_vm12 = vmand %vm297_vm9, %vm299_vm10  ;;  %v330_v50 = vsel %vm1017_vm11, %v272_v31, 0.0  ;;  %v332_v53 = vsel %vm1017_vm11, %v274_v34, 0.0  ;;  %v334_v63 = vsel %vm1017_vm11, %v276_v40, 0.0  ;;  %v313_v1 = vadd.f32 %v312_v55, %v311_v57 }
  0x71   : > { %v331_v52 = vsel %vm1022_vm12, %v273_v33, 0.0  ;;  %v333_v56 = vsel %vm1022_vm12, %v275_v35, 0.0  ;;  %v338_v58 = vsel %vm304_vm6, %v330_v50, 0.0  ;;  %v341_v60 = vsel %vm304_vm6, %v332_v53, 0.0 }
  0x72   : > { %v339_v59 = vsel %vm304_vm6, %v331_v52, 0.0  ;;  %v343_v2 = vsel %vm304_vm6, %v333_v56, 0.0  ;;  %v335_v4 = vsel %vm1022_vm12, %v277_v47, 0.0  ;;  %v315_v6 = vadd.f32 %v314_v62, %v313_v1 }
  0x73   : > { %v340_v0 = vadd.f32 %v339_v59, %v338_v58  ;;  %v345_v7 = vsel %vm304_vm6, %v334_v63, 0.0  ;;  %v336_v9 = vsel %vm1017_vm11, %v278_v54, 0.0  ;;  %v347_v12 = vsel %vm304_vm6, %v335_v4, 0.0 }
  0x74   : > { %v317_v11 = vadd.f32 %v316_v3, %v315_v6  ;;  %v337_v13 = vsel %vm1022_vm12, %v279_v61, 0.0  ;;  %v349_v16 = vsel %vm304_vm6, %v336_v9, 0.0 }
  0x75   : > { %v342_v5 = vadd.f32 %v341_v60, %v340_v0  ;;  %v351_v19 = vsel %vm304_vm6, %v337_v13, 0.0 }
  0x76   : > { %v319_v15 = vadd.f32 %v318_v8, %v317_v11 }
  0x77   : > { %v344_v10 = vadd.f32 %v343_v2, %v342_v5 }
  0x78   : > { %v320_v18 = vrot.slane %v319_v15, 4 }
  0x79   : > { %v346_v14 = vadd.f32 %v345_v7, %v344_v10 }
  0x7a   : > { %v321_v21 = vadd.f32 %v320_v18, %v319_v15 }
  0x7b   : > { %v348_v17 = vadd.f32 %v347_v12, %v346_v14 }
  0x7c   : > { %v322_v23 = vrot.slane %v321_v21, 2 }
  0x7d   : > { %v350_v20 = vadd.f32 %v349_v16, %v348_v17 }
  0x7e   : > { %v323_v25 = vadd.f32 %v322_v23, %v321_v21 }
  0x7f   : > { %v352_v22 = vadd.f32 %v351_v19, %v350_v20 }
  0x80   : > { %v324_v27 = vrot.slane %v323_v25, 1 }
  0x81   : > { %v353_v24 = vrot.slane %v352_v22, 4 }
  0x82   : > { %v325_v30 = vadd.f32 %v324_v27, %v323_v25 }
  0x83   : > { %v354_v26 = vadd.f32 %v353_v24, %v352_v22 }
  0x85   : > { %v355_v28 = vrot.slane %v354_v26, 2 }
  0x87   : > { %v356_v29 = vadd.f32 %v355_v28, %v354_v26 }
  0x89   : > { %v357_v31 = vrot.slane %v356_v29, 1 }
  0x8b   : > { %v358_v32 = vadd.f32 %v357_v31, %v356_v29 }
  0x8d   : > { %v360_v33 = vsel %vm359_vm13, %v325_v30, %v358_v32 }
  0x8e   : > { %362 = vst.msk [vmem:[%s228_s28] sm:$0x3] %vm361_vm14, %v360_v33 }
  0x8f   : > { %660 = shalt.err (!%p657_p0)
}
  0x90   : > { %s661_s17 = scalar_lea.hbm %s1062_s18, 32  ;;  %s665_s15 = scalar_lea.hbm %s1112_s3, 64 }
  0x91   : > { %p662_p4 = scmp.ne.s32.totalorder %s1062_s18, %s661_s17  ;;  %p666_p8 = scmp.lt.u32.totalorder %s1062_s18, %s1112_s3 }
  0x92   : > { %p667_p7 = scmp.lt.u32.totalorder %s665_s15, %s661_s17  ;;  %p669_p3 = scmp.lt.u32.totalorder %s661_s17, %s1062_s18 }
  0x93   : > { %p663_p9 = pnand %p662_p4, %p1137_p6 }
  0x94   : > { %p668_p11 = por %p667_p7, %p666_p8 }
  0x95   : > { %p664_p5 = pneg %p663_p9 }
  0x96   : > { %p670_p1 = por %p669_p3, %p668_p11 }
  0x98   : > { %p671_p2 = pnand %p670_p1, %p664_p5 }
  0x9a   : > { %674 = shalt.err (!%p671_p2)
}
  0x9b   : > { %511 = dma.vmem_to_hbm [thread:$0]  (%p1137_p6), %s1057_s5, 32, %s1062_s18, %s364_s10  }
  0x9c PF: > { %s390_s27 = sand.u32 1, %s715_s22   ;;  %p1138_p10 = scmp.ne.s32.totalorder %s1118_s9, 0 }
  0x9d   : > { %p1139_p13 = scmp.ge.s32.totalorder %s735_s0, 2  ;;  %s391_s11 = scalar_lea.sflag [#allocation6], %s390_s27 }
  0x9f   : > { %p521_p12 = pnand %p1139_p13, %p1138_p10 }
  0xa1   : > { %710 = dma.done.wait (!%p521_p12), %s391_s11, 32  }
  0xa2   : > { %712 = vsyncadd (!%p521_p12), %s391_s11, 4294967264  ;;  %s26_s0 = sadd.s32 1, %s735_s0   ;;  %s1140_s22 = smov %s719_s23 }
  0xa3   : > { %p23_p0 = scmp.ge.s32.totalorder %s26_s0, 4   ;;  %s1141_s23 = smov %s723_s24 }
  0xa4   : > { %s1142_s24 = smov %s831_s8  ;;  %s1143_s25 = smov %s731_s26 }
  0xa5   : > { %s1144_s26 = smov %s1146_s29  ;;  %25 = sbr.rel (!%p23_p0) target bundleno = 20 (0x14), region = 86 }
  0xac   :  { %396 = vsyncpa [#allocation5], 1 }
  0xad   :  { %398 = vsyncpa [#allocation5 + $0x1], 1 }
  0xae   :  { %399 = vsyncpa [#allocation8], 1 }
  0xaf   :  { %401 = vsyncpa [#allocation8 + $0x1], 1 }
  0xb0   :  { %402 = vsyncpa [#allocation6], 1 }
  0xb1   :  { %404 = vsyncpa [#allocation6 + $0x1], 1 }

</bundles_post_ra>
